<compile_context>
chip_gen: v6e
topology: v6e:2x2x1
jax: 0.10.0
libtpu: 0.0.40
codegen_flags: <defaults>
</compile_context>

<pallas_src>
import functools

import jax
import jax.numpy as jnp
from jax import lax
from jax.experimental import pallas as pl
from jax.experimental.pallas import tpu as pltpu


def _round_up(x, m):
    return ((x + m - 1) // m) * m


def _leaf_kernel(x_ref, w_ref, b_ref, w2_ref, o_ref, *, skip_col):
    # x: (TB, F) bf16/f32, w: (F, N) bf16/f32, b: (1, N) f32, w2: (1, N) f32
    z = jnp.dot(x_ref[...], w_ref[...], preferred_element_type=jnp.float32)
    z = z + b_ref[...]                                   # (TB, N) f32
    # relu on hidden columns; the fused skip column passes through untouched.
    col = lax.broadcasted_iota(jnp.int32, z.shape, 1)
    h = jnp.where(col == skip_col, z, jnp.maximum(z, 0.0))
    # N=1 projection as VPU multiply + lane (XLU) reduction; skip column has
    # weight 1.0 so it is summed straight into the output.
    y = jnp.sum(h * w2_ref[...], axis=-1, keepdims=True)  # (TB, 1)
    # NOTE: lane-dense output reshaping (out last dim 128) is a secondary,
    # measure-first optimization; output bytes are negligible vs x here.
    o_ref[...] = y.astype(o_ref.dtype)


def leaf_classifier(x, w1, b1, w2, b2, ws, bs, *, tile_b=1024, use_bf16=True):
    """x: (B, F). w1: (F, H), b1: (H,), w2: (H, 1), b2: (1,), ws: (F, 1),
    bs: (1,).  Weights are the PyTorch Linear weights pre-transposed to
    (in_dim, out_dim).  Returns (B, 1) in x.dtype."""
    B, F = x.shape
    H = w1.shape[1]

    # ---- host-side fusion: one lane-dense input projection ----
    n = _round_up(H + 1, 128)          # hidden + skip column, padded to 128 lanes
    skip_col = H
    w_in = jnp.zeros((F, n), jnp.float32)
    w_in = w_in.at[:, :H].set(w1.astype(jnp.float32))
    w_in = w_in.at[:, skip_col].set(ws[:, 0].astype(jnp.float32))

    b_in = jnp.zeros((1, n), jnp.float32)
    b_in = b_in.at[0, :H].set(b1.astype(jnp.float32))
    # collapse both scalar biases (skip bias + mlp2 bias) into the skip column
    b_in = b_in.at[0, skip_col].set((bs[0] + b2[0]).astype(jnp.float32))

    w2_row = jnp.zeros((1, n), jnp.float32)
    w2_row = w2_row.at[0, :H].set(w2[:, 0].astype(jnp.float32))
    w2_row = w2_row.at[0, skip_col].set(1.0)

    in_dtype = jnp.bfloat16 if use_bf16 else jnp.float32
    x_in = x.astype(in_dtype)
    w_in = w_in.astype(in_dtype)

    # ---- batch tiling (double-buffered x DMA, resident weights) ----
    tb = min(tile_b, _round_up(B, 8))
    b_pad = _round_up(B, tb)
    if b_pad != B:
        x_in = jnp.pad(x_in, ((0, b_pad - B), (0, 0)))
    grid = (b_pad // tb,)

    kernel = functools.partial(_leaf_kernel, skip_col=skip_col)

    out = pl.pallas_call(
        kernel,
        out_shape=jax.ShapeDtypeStruct((b_pad, 1), x.dtype),
        grid_spec=pltpu.PrefetchScalarGridSpec(
            num_scalar_prefetch=0,
            grid=grid,
            in_specs=[
                pl.BlockSpec((tb, F), lambda i: (i, 0)),   # x: tiled over batch
                pl.BlockSpec((F, n), lambda i: (0, 0)),    # fused W (resident)
                pl.BlockSpec((1, n), lambda i: (0, 0)),    # fused bias (resident)
                pl.BlockSpec((1, n), lambda i: (0, 0)),    # w2 row (resident)
            ],
            out_specs=pl.BlockSpec((tb, 1), lambda i: (i, 0)),
        ),
        compiler_params=pltpu.CompilerParams(
            dimension_semantics=("parallel",)),   # 2-TC sharding on v7x
    )(x_in, w_in, b_in, w2_row)
    return out[:B]


if __name__ == "__main__":
    key = jax.random.PRNGKey(0)
    B, FEAT, HID = 8, 32, 32   # small shapes consistent with the module

    keys = jax.random.split(key, 7)
    x  = jax.random.normal(keys[0], (B, FEAT), jnp.float32)
    # PyTorch Linear stores weight as (out, in); we build directly as (in, out).
    w1 = jax.random.normal(keys[1], (FEAT, HID), jnp.float32) * 0.1
    b1 = jax.random.normal(keys[2], (HID,), jnp.float32) * 0.1
    w2 = jax.random.normal(keys[3], (HID, 1), jnp.float32) * 0.1
    b2 = jax.random.normal(keys[4], (1,), jnp.float32) * 0.1
    ws = jax.random.normal(keys[5], (FEAT, 1), jnp.float32) * 0.1
    bs = jax.random.normal(keys[6], (1,), jnp.float32) * 0.1

    out = jax.block_until_ready(leaf_classifier(x, w1, b1, w2, b2, ws, bs))
    assert out.shape == (B, 1)

    # Tight check: reference built from the same bf16-rounded x/W (isolates the
    # explicit mixed-precision cast from any kernel math error).
    xq  = x.astype(jnp.bfloat16).astype(jnp.float32)
    w1q = w1.astype(jnp.bfloat16).astype(jnp.float32)
    wsq = ws.astype(jnp.bfloat16).astype(jnp.float32)
    hq = jnp.maximum(xq @ w1q + b1, 0.0)
    ref_q = (xq @ wsq + bs) + (hq @ w2 + b2)
    assert jnp.allclose(out, ref_q, atol=1e-3, rtol=1e-3), "kernel math mismatch"

    # Loose check: exact f32 PyTorch forward semantics (mixed-precision tol).
    h_ref = jnp.maximum(x @ w1 + b1, 0.0)
    ref = (x @ ws + bs) + (h_ref @ w2 + b2)
    assert jnp.allclose(out, ref, atol=5e-2, rtol=5e-2), "semantics mismatch"

    print("KERNEL_OK")
</pallas_src>

<mosaic_0001>
module attributes {stable_mosaic.version = 11 : i64} {
  func.func @_leaf_kernel(%arg0: i32, %arg1: memref<8x32xbf16, #tpu.memory_space<vmem>>, %arg2: memref<32x128xbf16, #tpu.memory_space<vmem>>, %arg3: memref<1x128xf32, #tpu.memory_space<vmem>>, %arg4: memref<1x128xf32, #tpu.memory_space<vmem>>, %arg5: memref<8x1xf32, #tpu.memory_space<vmem>>) attributes {dimension_semantics = [#tpu.dimension_semantics<parallel>], iteration_bounds = array<i64: 1>, scalar_prefetch = 0 : i64, scratch_operands = 0 : i64, tpu.core_type = #tpu.core_type<tc>, window_params = [{transform_indices = @transform_0, window_bounds = array<i64: 8, 32>}, {pipeline_mode = #tpu.pipeline_mode<synchronous>, transform_indices = @transform_1, window_bounds = array<i64: 32, 128>}, {pipeline_mode = #tpu.pipeline_mode<synchronous>, transform_indices = @transform_2, window_bounds = array<i64: 1, 128>}, {pipeline_mode = #tpu.pipeline_mode<synchronous>, transform_indices = @transform_3, window_bounds = array<i64: 1, 128>}, {transform_indices = @transform_4, window_bounds = array<i64: 8, 1>}]} {
    %c0 = arith.constant 0 : index
    %c0_0 = arith.constant 0 : index
    %0 = vector.load %arg1[%c0, %c0_0] : memref<8x32xbf16, #tpu.memory_space<vmem>>, vector<8x32xbf16>
    %c0_1 = arith.constant 0 : index
    %c0_2 = arith.constant 0 : index
    %1 = vector.load %arg2[%c0_1, %c0_2] : memref<32x128xbf16, #tpu.memory_space<vmem>>, vector<32x128xbf16>
    %cst = arith.constant dense<0.000000e+00> : vector<8x128xf32>
    %2 = tpu.matmul %0, %1, %cst {dimension_numbers = #tpu.dot_dimension_numbers<[1], [0], [0], [1], [0, 0, 1, 1], [], []>} : vector<8x32xbf16>, vector<32x128xbf16>, vector<8x128xf32> -> vector<8x128xf32>
    %c0_3 = arith.constant 0 : index
    %c0_4 = arith.constant 0 : index
    %3 = vector.load %arg3[%c0_3, %c0_4] : memref<1x128xf32, #tpu.memory_space<vmem>>, vector<1x128xf32>
    %4 = vector.broadcast %3 : vector<1x128xf32> to vector<8x128xf32>
    %5 = arith.addf %2, %4 : vector<8x128xf32>
    %6 = tpu.iota {dimensions = array<i32: 1>} : vector<8x128xi32>
    %c32_i32 = arith.constant 32 : i32
    %7 = vector.broadcast %c32_i32 : i32 to vector<8x128xi32>
    %8 = arith.cmpi eq, %6, %7 : vector<8x128xi32>
    %cst_5 = arith.constant 0.000000e+00 : f32
    %9 = vector.broadcast %cst_5 : f32 to vector<8x128xf32>
    %10 = arith.maximumf %5, %9 : vector<8x128xf32>
    %11 = arith.select %8, %5, %10 : vector<8x128xi1>, vector<8x128xf32>
    %c0_6 = arith.constant 0 : index
    %c0_7 = arith.constant 0 : index
    %12 = vector.load %arg4[%c0_6, %c0_7] : memref<1x128xf32, #tpu.memory_space<vmem>>, vector<1x128xf32>
    %13 = vector.broadcast %12 : vector<1x128xf32> to vector<8x128xf32>
    %14 = arith.mulf %11, %13 : vector<8x128xf32>
    %cst_8 = arith.constant dense<0.000000e+00> : vector<8xf32>
    %15 = vector.multi_reduction <add>, %14, %cst_8 [1] : vector<8x128xf32> to vector<8xf32>
    %16 = vector.shape_cast %15 : vector<8xf32> to vector<8x1xf32>
    %c0_9 = arith.constant 0 : index
    %c0_10 = arith.constant 0 : index
    %17 = vector.load %arg5[%c0_9, %c0_10] : memref<8x1xf32, #tpu.memory_space<vmem>>, vector<8x1xf32>
    tpu.vector_store %arg5[%c0_9, %c0_10], %16 {strides = array<i32>} : memref<8x1xf32, #tpu.memory_space<vmem>>, vector<8x1xf32>,
    return
  }
  func.func @transform_0(%arg0: i32) -> (i32, i32) {
    %c0_i32 = arith.constant 0 : i32
    %c0_i32_0 = arith.constant 0 : i32
    return %arg0, %c0_i32 : i32, i32
  }
  func.func @transform_1(%arg0: i32) -> (i32, i32) {
    %c0_i32 = arith.constant 0 : i32
    %c0_i32_0 = arith.constant 0 : i32
    %c0_i32_1 = arith.constant 0 : i32
    return %c0_i32, %c0_i32_0 : i32, i32
  }
  func.func @transform_2(%arg0: i32) -> (i32, i32) {
    %c0_i32 = arith.constant 0 : i32
    %c0_i32_0 = arith.constant 0 : i32
    %c0_i32_1 = arith.constant 0 : i32
    return %c0_i32, %c0_i32_0 : i32, i32
  }
  func.func @transform_3(%arg0: i32) -> (i32, i32) {
    %c0_i32 = arith.constant 0 : i32
    %c0_i32_0 = arith.constant 0 : i32
    %c0_i32_1 = arith.constant 0 : i32
    return %c0_i32, %c0_i32_0 : i32, i32
  }
  func.func @transform_4(%arg0: i32) -> (i32, i32) {
    %c0_i32 = arith.constant 0 : i32
    %c0_i32_0 = arith.constant 0 : i32
    return %arg0, %c0_i32 : i32, i32
  }
}

</mosaic_0001>

<bundles_post_ra>
// kernel: tpu_custom_call.1
= control target key start
LH: loop header
LB: loop body
LE: loop exit
PB: predicated region body
PF: predicated region fallthrough
CT: control target
= control target key end

     0   :  { %9 = vsyncpa [#allocation3], 0  ;;  %s249_s0 = inlined_call_operand.hbm [shape: bf16[8,32], index: 0, kind: input, shape index: {}]   ;;  %s250_s1 = inlined_call_operand.hbm [shape: bf16[32,128], index: 1, kind: input, shape index: {}]   ;;  %s251_s2 = inlined_call_operand.vmem [shape: f32[1,128], index: 2, kind: input, shape index: {}]   ;;  %s252_s3 = inlined_call_operand.vmem [shape: f32[1,128], index: 3, kind: input, shape index: {}]   ;;  %s253_s4 = inlined_call_operand.vmem [shape: f32[8,1], index: 4, kind: output, shape index: {}]  }
   0x1   :  { %10 = vsyncpa [#allocation5], 0  ;;  %s203_s15 = smov [#allocation2]   ;;  %s204_s17 = smov [#allocation4]  }
   0x2   :  { %s17_s16 = sshll.u32 %s203_s15, 4  ;;  %s26_s18 = sshll.u32 %s204_s17, 4  ;;  %s18_s16 = int_to_ptr.vmem [resolvable:$true] %s17_s16  ;;  %s27_s18 = int_to_ptr.vmem [resolvable:$true] %s26_s18 }
   0x3   :  { %s167_s19 = scalar_lea.vmem %s18_s16, 64  ;;  %p172_p1 = scmp.lt.s32.totalorder %s18_s16, %s18_s16 }
   0x4   :  { %p168_p0 = scmp.ne.s32.totalorder %s18_s16, %s167_s19  ;;  %p173_p2 = scmp.lt.s32.totalorder %s167_s19, %s167_s19 }
   0x6   :  { %p174_p3 = por %p173_p2, %p172_p1 }
   0x8   :  { %p175_p4 = pnand %p174_p3, %p168_p0 }
   0xa   :  { %178 = shalt.err (!%p175_p4)
}
   0xb   :  { %20 = dma.hbm_to_vmem [thread:$0]  %s249_s0, 64, %s18_s16, [#allocation3]  }
   0xc   :  { %s187_s22 = scalar_lea.vmem %s27_s18, 256  ;;  %p192_p6 = scmp.lt.s32.totalorder %s27_s18, %s27_s18 }
   0xd   :  { %p188_p5 = scmp.ne.s32.totalorder %s27_s18, %s187_s22  ;;  %p193_p7 = scmp.lt.s32.totalorder %s187_s22, %s187_s22 }
   0xf   :  { %p194_p8 = por %p193_p7, %p192_p6 }
  0x11   :  { %p195_p9 = pnand %p194_p8, %p188_p5 }
  0x13   :  { %198 = shalt.err (!%p195_p9)
}
  0x14   :  { %s205_s23 = smov 64   ;;  %s206_s24 = smov 4  }
  0x15   :  { %32 = dma.hbm_to_vmem [thread:$0]  %s250_s1, 256, %s27_s18, [#allocation5], %s205_s23, %s205_s23, %s206_s24  }
  0x16   :  { %199 = dma.done.wait [#allocation3], 64  }
  0x17   :  { %200 = vsyncadd [#allocation3], 4294967232 }
  0x18   :  { %201 = dma.done.wait [#allocation5], 256  }
  0x19   :  { %202 = vsyncadd [#allocation5], 4294967040  ;;  %v207_v0 = vmov 0.0   ;;  %vm208_vm0 = vmmov 0   ;;  %v157_v1 = vld [vmem:[#allocation4 + $0x8] sm:$0xff]   ;;  %v158_v2 = vld [vmem:[#allocation4] sm:$0xff]   ;;  %v112_v4 = vlaneseq }
  0x1a   :  { %143 = vmatprep.subr.bf16.mxu0 %v207_v0  ;;  %147 = vmatprep.mubr.msk.bf16.mxu0 %vm208_vm0, %v207_v0  ;;  %v44_v3 = vld [vmem:[#allocation2] sm:$0xf]  ;;  %vm68_vm1 = vcmask 261120   ;;  %vm127_vm3 = vcmask 7168  }
  0x1b   :  { %144 = vmatpush3.bf16.msra.mxu0 %v157_v1  ;;  %v135_v5 = vld [vmem:[%s251_s2] ss:$0 sm:$0xff]  ;;  %v113_v6 = vand.u32 127, %v112_v4 }
  0x1c   :  { %145 = vmatprep.subr.bf16.mxu0 %v207_v0  ;;  %v139_v11 = vld [vmem:[%s252_s3] ss:$0 sm:$0xff] }
  0x1d   :  { %vm114_vm2 = vcmp.eq.s32.totalorder %v113_v6, 32 }
  0x1f   :  { %146 = vmatpush3.bf16.msra.mxu0 %v158_v2 }
  0x22   :  { %148 = vmatmul.mubr.msk.bf16.vlgmr.msra.gmra.mxu0 %vm68_vm1, %v44_v3 }
  0xe2   :  { %v106_v7 = vpop.f32.mrf.mxu0 }
  0xe3   :  { %v107_v8 = vadd.f32 %v135_v5, %v106_v7 }
  0xe4   :  { %v149_v9 = vpop.f32.mrf.mxu0 }
  0xe5   :  { %v115_v10 = vmax.f32 %v107_v8, 0.0 }
  0xe6   :  { %v109_v12 = vpop.f32.mrf.mxu0 }
  0xe7   :  { %v116_v13 = vsel %vm114_vm2, %v107_v8, %v115_v10 }
  0xe8   :  { %v150_v14 = vpop.f32.mrf.mxu0  ;;  %v124_v15 = vmul.f32 %v139_v11, %v116_v13 }
  0xea   :  { %125 = vadd.xlane.f32.xlu0 %v124_v15 }
 0x173   :  { %v126_v16 = vpop.xlane.xlu0 %125 }
 0x174   :  { %128 = vst.msk [vmem:[%s253_s4] sm:$0xff] %vm127_vm3, %v126_v16 }
 0x175   :  { %133 = vsyncpa [#allocation3], 1 }
 0x176   :  { %134 = vsyncpa [#allocation5], 1 }

</bundles_post_ra>
